<compile_context>
chip_gen: v6e
topology: v6e:2x2x1
jax: 0.10.0
libtpu: 0.0.40
codegen_flags: <defaults>
</compile_context>

<pallas_src>
import jax
import jax.numpy as jnp
from jax.experimental import pallas as pl
from jax.experimental.pallas import tpu as pltpu


def _identity_kernel(x_ref, o_ref):
    # Pure passthrough: VMEM load -> VMEM store. Last dim is a multiple of 128,
    # so stores are wide/unmasked.
    o_ref[...] = x_ref[...]


_LANE_CANDIDATES = (2048, 1024, 512, 256, 128)


def _sublane_quantum(dtype):
    # Packed-vreg row quantum: 8 rows for 32-bit, 16 for 16-bit, 32 for 8-bit.
    itemsize = jnp.dtype(dtype).itemsize
    if itemsize >= 4:
        return 8
    if itemsize == 2:
        return 16
    return 32


def _vmem_budget():
    """Return (per-buffer tile cap bytes, vmem_limit_bytes) for this TPU."""
    vmem_bytes = 0
    try:
        vmem_bytes = getattr(pltpu.get_tpu_info(), "vmem_capacity_bytes", 0)
    except Exception:
        vmem_bytes = 0
    if vmem_bytes >= 100 * 1024 * 1024:
        # v5e / v6e: 128 MiB physical VMEM -> big tiles amortize the ~0.35 us
        # per-grid-step overhead; 4x (in+out, double-buffered) <= 32 MiB << 64.
        return 8 * 1024 * 1024, 64 * 1024 * 1024
    # v7x (64 MiB physical) or unknown: stay conservative.
    return 4 * 1024 * 1024, 32 * 1024 * 1024


def _pick_lane(n_elems, quantum):
    # Prefer a lane width that also makes the row count a multiple of the
    # dtype's sublane quantum (full packed-vreg tiles); otherwise the widest
    # divisor of the element count.
    for lane in _LANE_CANDIDATES:
        if n_elems % lane == 0 and (n_elems // lane) % quantum == 0:
            return lane
    for lane in _LANE_CANDIDATES:
        if n_elems % lane == 0:
            return lane
    return None


def _pick_block_rows(rows, max_rows, quantum):
    """Largest exact divisor of `rows` that is a multiple of `quantum` and
    <= max_rows, so every grid step is a full block (unmasked stores)."""
    if rows <= max_rows:
        return rows  # full extent is always a legal block shape
    start = max(quantum, (max_rows // quantum) * quantum)
    r = start
    while r >= quantum:
        if rows % r == 0:
            return r
        r -= quantum
    # No aligned exact divisor: accept a (possibly partial) last block.
    return start


def _pallas_identity_copy(x):
    """Tiled, aliased, software-pipelined HBM identity copy of x."""
    n_elems = x.size
    if n_elems == 0:
        return x

    dsize = jnp.dtype(x.dtype).itemsize
    n_bytes = n_elems * dsize
    tile_cap_bytes, vmem_limit = _vmem_budget()
    quantum = _sublane_quantum(x.dtype)
    lane = _pick_lane(n_elems, quantum)
    cost = pl.CostEstimate(flops=0, transcendentals=0, bytes_accessed=2 * n_bytes)

    if lane is None:
        # Element count not a multiple of 128 (ragged).
        if n_bytes <= tile_cap_bytes:
            # Small: one full-array block (block_shape == full dims is legal),
            # now with an explicit VMEM limit.
            return pl.pallas_call(
                _identity_kernel,
                out_shape=jax.ShapeDtypeStruct(x.shape, x.dtype),
                input_output_aliases={0: 0},
                compiler_params=pltpu.CompilerParams(vmem_limit_bytes=vmem_limit),
                cost_estimate=cost,
            )(x)
        # TODO(synk): tile the 128-aligned bulk and copy only the short tail;
        # for a pure identity, returning x is byte-for-byte equivalent.
        return x

    rows = n_elems // lane
    max_rows = max(quantum, tile_cap_bytes // (lane * dsize))
    block_rows = _pick_block_rows(rows, max_rows, quantum)

    slab = x.reshape(rows, lane)  # contiguous reshape: metadata only
    grid = (pl.cdiv(rows, block_rows),)

    out_slab = pl.pallas_call(
        _identity_kernel,
        out_shape=jax.ShapeDtypeStruct((rows, lane), x.dtype),
        grid=grid,
        in_specs=[pl.BlockSpec((block_rows, lane), lambda i: (i, 0))],
        out_specs=pl.BlockSpec((block_rows, lane), lambda i: (i, 0)),
        input_output_aliases={0: 0},
        compiler_params=pltpu.CompilerParams(
            dimension_semantics=("parallel",),
            vmem_limit_bytes=vmem_limit,
        ),
        cost_estimate=cost,
    )(slab)
    return out_slab.reshape(x.shape)


def shape_printer(x, *, force_pallas_copy=False):
    """Equivalent of ShapePrinter.forward: print(x.size()); return x.

    Default path: print the (static) shape and return x unchanged -- zero HBM
    traffic, since the aliased identity copy would only re-write identical
    bytes.  Set force_pallas_copy=True to route the identity through the
    tiled, aliased Pallas copy kernel instead.
    """
    # NOTE: this host print fires at Python trace time; under jax.jit it
    # prints once per compilation (the shape is static), not once per call.
    print(tuple(x.shape))
    if not force_pallas_copy:
        return x
    return _pallas_identity_copy(x)


if __name__ == "__main__":
    key = jax.random.PRNGKey(0)
    x = jax.random.normal(key, (2, 4, 16, 16), dtype=jnp.float32)

    # Fast (recommended) path: pure identity, no kernel launch.
    y_fast = jax.block_until_ready(shape_printer(x))

    # Also exercise the Pallas identity-copy kernel once.
    y_kernel = jax.block_until_ready(shape_printer(x, force_pallas_copy=True))

    assert y_fast.shape == x.shape and y_fast.dtype == x.dtype
    assert y_kernel.shape == x.shape and y_kernel.dtype == x.dtype
    assert bool(jnp.array_equal(y_fast, x))
    assert bool(jnp.array_equal(y_kernel, x))
    print("KERNEL_OK")
</pallas_src>

<mosaic_0001>
module attributes {stable_mosaic.version = 11 : i64} {
  func.func @_identity_kernel(%arg0: i32, %arg1: memref<8x256xf32, #tpu.memory_space<vmem>>, %arg2: memref<8x256xf32, #tpu.memory_space<vmem>>) attributes {dimension_semantics = [#tpu.dimension_semantics<parallel>], iteration_bounds = array<i64: 1>, scalar_prefetch = 0 : i64, scratch_operands = 0 : i64, tpu.core_type = #tpu.core_type<tc>, window_params = [{transform_indices = @transform_0, window_bounds = array<i64: 8, 256>}, {transform_indices = @transform_1, window_bounds = array<i64: 8, 256>}]} {
    %c0 = arith.constant 0 : index
    %c0_0 = arith.constant 0 : index
    %0 = vector.load %arg1[%c0, %c0_0] : memref<8x256xf32, #tpu.memory_space<vmem>>, vector<8x256xf32>
    %c0_1 = arith.constant 0 : index
    %c0_2 = arith.constant 0 : index
    %1 = vector.load %arg2[%c0_1, %c0_2] : memref<8x256xf32, #tpu.memory_space<vmem>>, vector<8x256xf32>
    tpu.vector_store %arg2[%c0_1, %c0_2], %0 {strides = array<i32>} : memref<8x256xf32, #tpu.memory_space<vmem>>, vector<8x256xf32>,
    return
  }
  func.func @transform_0(%arg0: i32) -> (i32, i32) {
    %c0_i32 = arith.constant 0 : i32
    %c0_i32_0 = arith.constant 0 : i32
    return %arg0, %c0_i32 : i32, i32
  }
  func.func @transform_1(%arg0: i32) -> (i32, i32) {
    %c0_i32 = arith.constant 0 : i32
    %c0_i32_0 = arith.constant 0 : i32
    return %arg0, %c0_i32 : i32, i32
  }
}

</mosaic_0001>

<bundles_post_ra>
// kernel: tpu_custom_call.1
= control target key start
LH: loop header
LB: loop body
LE: loop exit
PB: predicated region body
PF: predicated region fallthrough
CT: control target
= control target key end

     0   :  { %6 = vsyncpa [#allocation3], 0  ;;  %s104_s0 = inlined_call_operand.hbm [shape: f32[8,256], index: 0, kind: input, shape index: {}, may-alias: {0,1}]   ;;  %s105_s1 = inlined_call_operand.hbm [shape: f32[8,256], index: 1, kind: output, shape index: {}, may-alias: {0,1}]  }
   0x1   :  { %7 = vsyncpa [#allocation4], 0  ;;  %s86_s6 = smov [#allocation2]  }
   0x2   :  { %s14_s7 = sshll.u32 %s86_s6, 4  ;;  %s15_s7 = int_to_ptr.vmem [resolvable:$true] %s14_s7 }
   0x3   :  { %s50_s8 = scalar_lea.vmem %s15_s7, 256  ;;  %p55_p1 = scmp.lt.s32.totalorder %s15_s7, %s15_s7 }
   0x4   :  { %p51_p0 = scmp.ne.s32.totalorder %s15_s7, %s50_s8  ;;  %p56_p2 = scmp.lt.s32.totalorder %s50_s8, %s50_s8 }
   0x6   :  { %p57_p3 = por %p56_p2, %p55_p1 }
   0x8   :  { %p58_p4 = pnand %p57_p3, %p51_p0 }
   0xa   :  { %61 = shalt.err (!%p58_p4)
}
   0xb   :  { %17 = dma.hbm_to_vmem [thread:$0]  %s104_s0, 256, %s15_s7, [#allocation3]  }
   0xc   :  { %82 = dma.done.wait [#allocation3], 256  }
   0xd   :  { %83 = vsyncadd [#allocation3], 4294967040  ;;  %s87_s11 = smov [#allocation5]   ;;  %v21_v0 = vld [vmem:[#allocation2] sm:$0xff]  ;;  %v22_v1 = vld [vmem:[#allocation2 + $0x8] sm:$0xff] }
   0xe   :  { %s31_s12 = sshll.u32 %s87_s11, 4  ;;  %23 = vst [vmem:[#allocation5] sm:$0xff] %v21_v0  ;;  %24 = vst [vmem:[#allocation5 + $0x8] sm:$0xff] %v22_v1  ;;  %s32_s12 = int_to_ptr.vmem [resolvable:$true] %s31_s12 }
   0xf   :  { %s62_s13 = scalar_lea.vmem %s32_s12, 256  ;;  %p67_p6 = scmp.lt.s32.totalorder %s32_s12, %s32_s12 }
  0x10   :  { %p63_p5 = scmp.ne.s32.totalorder %s32_s12, %s62_s13  ;;  %p68_p7 = scmp.lt.s32.totalorder %s62_s13, %s62_s13 }
  0x12   :  { %p69_p8 = por %p68_p7, %p67_p6 }
  0x14   :  { %p70_p9 = pnand %p69_p8, %p63_p5 }
  0x16   :  { %73 = shalt.err (!%p70_p9)
}
  0x17   :  { %34 = dma.vmem_to_hbm [thread:$0]  %s32_s12, 256, %s105_s1, [#allocation4]  }
  0x18   :  { %84 = dma.done.wait [#allocation4], 256  }
  0x19   :  { %85 = vsyncadd [#allocation4], 4294967040 }
  0x1a   :  { %38 = vsyncpa [#allocation3], 1 }
  0x1b   :  { %39 = vsyncpa [#allocation4], 1 }

</bundles_post_ra>
